<compile_context>
chip_gen: v5e
topology: v5e:2x2
jax: 0.10.0
libtpu: 0.0.40
codegen_flags: <defaults>
</compile_context>

<pallas_src>
import functools

import jax
import jax.numpy as jnp
from jax.experimental import pallas as pl
from jax.experimental.pallas import tpu as pltpu


def _round_up(x: int, m: int) -> int:
    return ((x + m - 1) // m) * m


# ---------------------------------------------------------------------------
# Kernels
# ---------------------------------------------------------------------------
def _linear_fused_kernel(x_ref, w_ref, b_ref, o_ref):
    # Single K tile: one MXU push, bias fused, no init/accumulate/epilogue.
    o_ref[...] = (
        jnp.dot(x_ref[...], w_ref[...], preferred_element_type=jnp.float32)
        + b_ref[...]
    ).astype(o_ref.dtype)


def _linear_multik_f32_kernel(x_ref, w_ref, b_ref, o_ref):
    # f32 output is resident across the K axis (its block index is (i, j)):
    # accumulate directly into o_ref -- no scratch, no zero-init, no final copy.
    k = pl.program_id(2)
    part = jnp.dot(x_ref[...], w_ref[...], preferred_element_type=jnp.float32)

    @pl.when(k == 0)
    def _first():
        o_ref[...] = part

    @pl.when(k > 0)
    def _rest():
        o_ref[...] += part

    @pl.when(k == pl.num_programs(2) - 1)
    def _bias():
        o_ref[...] += b_ref[...]


def _linear_multik_acc_kernel(x_ref, w_ref, b_ref, o_ref, acc_ref):
    # Fallback for non-f32 outputs: keep an f32 scratch accumulator.
    k = pl.program_id(2)

    @pl.when(k == 0)
    def _init():
        acc_ref[...] = jnp.zeros_like(acc_ref)

    acc_ref[...] += jnp.dot(
        x_ref[...], w_ref[...], preferred_element_type=jnp.float32
    )

    @pl.when(k == pl.num_programs(2) - 1)
    def _finalize():
        o_ref[...] = (acc_ref[...] + b_ref[...]).astype(o_ref.dtype)


# ---------------------------------------------------------------------------
# Wrapper
# ---------------------------------------------------------------------------
_TINY_BYTES = 2 * 1024 * 1024          # whole-problem-in-one-block threshold
_MAX_TM = 512
_MAX_TN = 1024
_MAX_TK = 1024
# Double-buffered working set with the caps above is <= ~18 MiB; 40 MiB leaves
# headroom and fits v5e/v6e (128 MiB phys) and v7x (64 MiB per TC).
_VMEM_LIMIT = 40 * 1024 * 1024


def _split_tm_for_two_cores(tm: int, m_al: int) -> int:
    # Ensure >= 2 parallel M blocks when possible so both v7x TCs get work.
    if m_al // tm < 2 and m_al >= 16:
        tm = _round_up(-(-m_al // 2), 8)
    return tm


@jax.jit
def logreg_forward(x, w, b):
    """nn.Linear(input_dim, output_dim) forward.

    x: (B, input_dim)
    w: (output_dim, input_dim)   (PyTorch nn.Linear convention)
    b: (output_dim,)
    returns: (B, output_dim)
    """
    B, d_in = x.shape
    d_out = w.shape[0]
    itemsize = x.dtype.itemsize

    wt = w.T                      # (d_in, d_out), transposed once outside kernel
    b2 = b.reshape(1, d_out)

    total_bytes = (B * d_in + d_in * d_out + d_out + B * d_out) * itemsize

    # -------- Path A: tiny problem -> single block, no grid, no padding. -----
    if total_bytes <= _TINY_BYTES:
        return pl.pallas_call(
            _linear_fused_kernel,
            out_shape=jax.ShapeDtypeStruct((B, d_out), x.dtype),
        )(x, wt, b2)

    # -------- Path B: single full-width K and N tiles, tile M only. ----------
    if d_in <= _MAX_TK and d_out <= _MAX_TN:
        m_al = _round_up(B, 8)
        tm = _split_tm_for_two_cores(min(_MAX_TM, m_al), m_al)
        m_pad = _round_up(B, tm)
        x_p = x if m_pad == B else jnp.pad(x, ((0, m_pad - B), (0, 0)))
        gm = m_pad // tm

        out = pl.pallas_call(
            _linear_fused_kernel,
            out_shape=jax.ShapeDtypeStruct((m_pad, d_out), x.dtype),
            grid=(gm,),
            in_specs=[
                pl.BlockSpec((tm, d_in), lambda i: (i, 0)),
                pl.BlockSpec((d_in, d_out), lambda i: (0, 0)),
                pl.BlockSpec((1, d_out), lambda i: (0, 0)),
            ],
            out_specs=pl.BlockSpec((tm, d_out), lambda i: (i, 0)),
            compiler_params=pltpu.CompilerParams(
                dimension_semantics=("parallel",),
                vmem_limit_bytes=_VMEM_LIMIT,
            ),
            cost_estimate=pl.CostEstimate(
                flops=2 * m_pad * d_in * d_out,
                transcendentals=0,
                bytes_accessed=itemsize
                * (m_pad * d_in + gm * (d_in * d_out + d_out) + m_pad * d_out),
            ),
        )(x_p, wt, b2)
        return out[:B] if m_pad != B else out

    # -------- Path C: general tiled (M, N, K) matmul. ------------------------
    m_al = _round_up(B, 8)
    n_al = _round_up(d_out, 128)
    k_al = _round_up(d_in, 128)

    tn = n_al if n_al <= _MAX_TN else 256   # single N tile when d_out modest
    tk = min(_MAX_TK, k_al)
    tm = min(_MAX_TM, m_al)

    n_pad = _round_up(d_out, tn)
    k_pad = _round_up(d_in, tk)
    gn, gk = n_pad // tn, k_pad // tk

    if gn < 2:
        tm = _split_tm_for_two_cores(tm, m_al)
    m_pad = _round_up(B, tm)
    gm = m_pad // tm

    x_p = x
    if (m_pad, k_pad) != (B, d_in):
        x_p = jnp.pad(x, ((0, m_pad - B), (0, k_pad - d_in)))
    wt_p = wt
    if (k_pad, n_pad) != (d_in, d_out):
        wt_p = jnp.pad(wt, ((0, k_pad - d_in), (0, n_pad - d_out)))
    b_p = b2 if n_pad == d_out else jnp.pad(b2, ((0, 0), (0, n_pad - d_out)))

    flops = 2 * m_pad * n_pad * k_pad
    # Account for re-reads under the (i, j, k) grid order: x is re-streamed
    # once per N tile, w once per M tile.
    bytes_accessed = itemsize * (
        gn * m_pad * k_pad + gm * k_pad * n_pad + gm * n_pad + m_pad * n_pad
    )
    cost = pl.CostEstimate(
        flops=flops, transcendentals=0, bytes_accessed=bytes_accessed
    )

    if gk == 1:
        # Single-K-tile specialization: fused kernel, 2-D parallel grid.
        out = pl.pallas_call(
            _linear_fused_kernel,
            out_shape=jax.ShapeDtypeStruct((m_pad, n_pad), x.dtype),
            grid=(gm, gn),
            in_specs=[
                pl.BlockSpec((tm, k_pad), lambda i, j: (i, 0)),
                pl.BlockSpec((k_pad, tn), lambda i, j: (0, j)),
                pl.BlockSpec((1, tn), lambda i, j: (0, j)),
            ],
            out_specs=pl.BlockSpec((tm, tn), lambda i, j: (i, j)),
            compiler_params=pltpu.CompilerParams(
                dimension_semantics=("parallel", "parallel"),
                vmem_limit_bytes=_VMEM_LIMIT,
            ),
            cost_estimate=cost,
        )(x_p, wt_p, b_p)
    else:
        if x.dtype == jnp.float32:
            kernel = _linear_multik_f32_kernel
            scratch = []
        else:
            kernel = _linear_multik_acc_kernel
            scratch = [pltpu.VMEM((tm, tn), jnp.float32)]
        out = pl.pallas_call(
            kernel,
            out_shape=jax.ShapeDtypeStruct((m_pad, n_pad), x.dtype),
            grid=(gm, gn, gk),
            in_specs=[
                pl.BlockSpec((tm, tk), lambda i, j, k: (i, k)),
                pl.BlockSpec((tk, tn), lambda i, j, k: (k, j)),
                pl.BlockSpec((1, tn), lambda i, j, k: (0, j)),
            ],
            out_specs=pl.BlockSpec((tm, tn), lambda i, j, k: (i, j)),
            scratch_shapes=scratch,
            compiler_params=pltpu.CompilerParams(
                dimension_semantics=("parallel", "parallel", "arbitrary"),
                vmem_limit_bytes=_VMEM_LIMIT,
            ),
            cost_estimate=cost,
        )(x_p, wt_p, b_p)

    return out[:B, :d_out]


if __name__ == "__main__":
    # Small shapes consistent with the module: batch=8, input_dim=32, output_dim=16
    B, input_dim, output_dim = 8, 32, 16

    key = jax.random.PRNGKey(0)
    kx, kw, kb = jax.random.split(key, 3)

    x = jax.random.normal(kx, (B, input_dim), dtype=jnp.float32)
    # Deterministic init mimicking nn.Linear default (uniform in +/- 1/sqrt(fan_in))
    bound = 1.0 / jnp.sqrt(input_dim)
    w = jax.random.uniform(
        kw, (output_dim, input_dim), minval=-bound, maxval=bound, dtype=jnp.float32
    )
    b = jax.random.uniform(
        kb, (output_dim,), minval=-bound, maxval=bound, dtype=jnp.float32
    )

    out = logreg_forward(x, w, b)
    jax.block_until_ready(out)

    # Cross-check against plain-JAX reference
    ref = x @ w.T + b
    assert out.shape == (B, output_dim)
    assert jnp.allclose(out, ref, atol=1e-5, rtol=1e-5), "mismatch vs reference"

    print("KERNEL_OK")
</pallas_src>

<mosaic_0001>
module attributes {stable_mosaic.version = 11 : i64} {
  func.func @_linear_fused_kernel(%arg0: memref<8x32xf32, #tpu.memory_space<vmem>>, %arg1: memref<32x16xf32, #tpu.memory_space<vmem>>, %arg2: memref<1x16xf32, #tpu.memory_space<vmem>>, %arg3: memref<8x16xf32, #tpu.memory_space<vmem>>) attributes {dimension_semantics = [], scalar_prefetch = 0 : i64, scratch_operands = 0 : i64, tpu.core_type = #tpu.core_type<tc>} {
    %c0 = arith.constant 0 : index
    %c0_0 = arith.constant 0 : index
    %0 = vector.load %arg0[%c0, %c0_0] : memref<8x32xf32, #tpu.memory_space<vmem>>, vector<8x32xf32>
    %c0_1 = arith.constant 0 : index
    %c0_2 = arith.constant 0 : index
    %1 = vector.load %arg1[%c0_1, %c0_2] : memref<32x16xf32, #tpu.memory_space<vmem>>, vector<32x16xf32>
    %cst = arith.constant dense<0.000000e+00> : vector<8x16xf32>
    %2 = tpu.matmul %0, %1, %cst {dimension_numbers = #tpu.dot_dimension_numbers<[1], [0], [0], [1], [0, 0, 1, 1], [], []>} : vector<8x32xf32>, vector<32x16xf32>, vector<8x16xf32> -> vector<8x16xf32>
    %c0_3 = arith.constant 0 : index
    %c0_4 = arith.constant 0 : index
    %3 = vector.load %arg2[%c0_3, %c0_4] : memref<1x16xf32, #tpu.memory_space<vmem>>, vector<1x16xf32>
    %4 = vector.broadcast %3 : vector<1x16xf32> to vector<8x16xf32>
    %5 = arith.addf %2, %4 : vector<8x16xf32>
    %c0_5 = arith.constant 0 : index
    %c0_6 = arith.constant 0 : index
    %6 = vector.load %arg3[%c0_5, %c0_6] : memref<8x16xf32, #tpu.memory_space<vmem>>, vector<8x16xf32>
    tpu.vector_store %arg3[%c0_5, %c0_6], %5 {strides = array<i32>} : memref<8x16xf32, #tpu.memory_space<vmem>>, vector<8x16xf32>,
    return
  }
}

</mosaic_0001>

<bundles_post_ra>
// kernel: logreg_forward.1
= control target key start
LH: loop header
LB: loop body
LE: loop exit
PB: predicated region body
PF: predicated region fallthrough
CT: control target
= control target key end

     0   :  { %s137_s0 = inlined_call_operand.vmem [shape: f32[8,32], index: 0, kind: input, shape index: {}]   ;;  %s138_s1 = inlined_call_operand.vmem [shape: f32[32,16], index: 1, kind: input, shape index: {}]   ;;  %s139_s2 = inlined_call_operand.vmem [shape: f32[1,16], index: 2, kind: input, shape index: {}]   ;;  %s140_s3 = inlined_call_operand.hbm [shape: f32[8,16], index: 3, kind: output, shape index: {}]  }
   0x1   :  { %v19_v0 = vld [vmem:[%s138_s1 + $0x18] sm:$0xff]  ;;  %v18_v1 = vld [vmem:[%s138_s1 + $0x10] sm:$0xff]  ;;  %v17_v2 = vld [vmem:[%s138_s1 + $0x8] sm:$0xff] }
   0x2   :  { %40 = vmatpush.msra.mxu0 %v19_v0 }
   0x3   :  { %8 = vsyncpa [#allocation3], 0  ;;  %v16_v3 = vld [vmem:[%s138_s1] sm:$0xff]  ;;  %vm24_vm0 = vcmask 261120   ;;  %s95_s24 = smov [#allocation2]   ;;  %s57_s28 = sshll.u32 %s140_s3, 4  ;;  %s58_s28 = int_to_ptr.hbm [resolvable:$true] %s57_s28 }
   0x4   :  { %41 = vmatpush.msra.mxu0 %v18_v1  ;;  %v15_v4 = vld [vmem:[%s137_s0] sm:$0xff]  ;;  %s55_s25 = sshll.u32 %s95_s24, 4  ;;  %vm48_vm1 = vcmask 130048   ;;  %s56_s25 = int_to_ptr.vmem [resolvable:$true] %s55_s25 }
   0x5   :  { %v68_v5 = vld [vmem:[%s139_s2] ss:$0 sm:$0xff] }
   0x6   :  { %42 = vmatpush.msra.mxu0 %v17_v2 }
   0x8   :  { %43 = vmatpush.msra.mxu0 %v16_v3 }
   0x9   :  { %66 = vmatmul.msk.f32.vlgmr.msra.gmra.mxu0 %vm24_vm0, %v15_v4 }
  0x86   :  { %v45_v6 = vpop.f32.mrf.mxu0 }
  0x87   :  { %v46_v7 = vadd.f32 %v68_v5, %v45_v6 }
  0x89   :  { %49 = vst.msk [vmem:[#allocation2] sm:$0xff] %vm48_vm1, %v46_v7 }
  0x8a   :  { %60 = dma.vmem_to_hbm [thread:$0]  %s56_s25, 128, %s58_s28, [#allocation3]  }
  0x8b   :  { %93 = dma.done.wait [#allocation3], 128  }
  0x8c   :  { %94 = vsyncadd [#allocation3], 4294967168 }
  0x8d   :  { %65 = vsyncpa [#allocation3], 1 }

</bundles_post_ra>
